<compile_context>
chip_gen: v7x
topology: tpu7x:2x2x1
jax: 0.10.0
libtpu: 0.0.40
codegen_flags: <defaults>
</compile_context>

<pallas_src>
import functools

import jax
import jax.numpy as jnp
from jax.experimental import pallas as pl
from jax.experimental.pallas import tpu as pltpu

MXU_DTYPE = jnp.bfloat16   # matmul operand dtype (accumulation stays f32)
BN_EPS = 1e-5              # PyTorch BatchNorm2d default
BASE = 8                   # sublane-aligned start row of the padded interior


# --------------------------------------------------------------------------
# Kernel
# --------------------------------------------------------------------------
def _resblock_kernel(x_ref, m1_ref, m2_ref, g1_ref, b1_ref, g2_ref, b2_ref,
                     out_ref, xpad_ref, *, N, H, W, C):
    """Fused ResBlock: out = x + convbnrelu2(convbnrelu1(x)).

    Kernel-view shapes (lane-dense: last dim = W*C, multiple of 128):
      x_ref    : (N, H, W*C)       f32   input rows (NHWC flattened over (W, C))
      m*_ref   : (3, W*C, W*C)     bf16  folded block-Toeplitz conv weights (per kh)
      g*_ref   : (1, W*C)          f32   BN gamma tiled per column (col j -> ch j % C)
      b*_ref   : (1, W*C)          f32   BN beta tiled per column
      out_ref  : (N, H, W*C)       f32
      xpad_ref : (N, H+16, W*C)    bf16  VMEM scratch; interior rows [BASE, BASE+H)
    """
    WC = W * C
    inv_cnt = 1.0 / float(N * H * W)

    # Zero ONLY the halo row blocks (once); interior rows are fully
    # overwritten before each conv stage.  Only rows BASE-1 and BASE+H are
    # ever read as halo, but zeroing the 8-row blocks keeps the stores
    # sublane-block shaped and is still tiny.
    halo = jnp.zeros((N, BASE, WC), dtype=xpad_ref.dtype)
    xpad_ref[:, 0:BASE, :] = halo
    xpad_ref[:, BASE + H:BASE + H + BASE, :] = halo

    def lane_group_sum(row):
        # (1, WC) -> every column j holds the sum over its channel class
        # (j % C), i.e. over the W lane-groups.  log2(W) cyclic XLU rolls,
        # fully lane-dense, no averaging-matrix matmuls.  Requires W = 2**k.
        s = row
        shift = C
        while shift < WC:
            s = s + pltpu.roll(s, shift, axis=1)
            shift *= 2
        return s

    def conv_bn_relu(m_ref, g_ref, b_ref):
        # --- 3x3 conv as three accumulated MXU matmuls (one per kh tap) -----
        # No im2col concat: each tap reads an H-shifted row window directly.
        lhs0 = xpad_ref[:, BASE - 1:BASE - 1 + H, :].reshape(N * H, WC)
        acc = jnp.dot(lhs0, m_ref[0], preferred_element_type=jnp.float32)
        for kh in (1, 2):
            lhs = xpad_ref[:, BASE - 1 + kh:BASE - 1 + kh + H, :].reshape(N * H, WC)
            acc = acc + jnp.dot(lhs, m_ref[kh],
                                preferred_element_type=jnp.float32)

        # --- BatchNorm2d, training-mode batch stats, single pass, f32 -------
        sum_cols = jnp.sum(acc, axis=0, keepdims=True)            # (1, WC)
        sumsq_cols = jnp.sum(acc * acc, axis=0, keepdims=True)    # (1, WC)
        mean_row = lane_group_sum(sum_cols) * inv_cnt              # E[x] per channel
        ex2_row = lane_group_sum(sumsq_cols) * inv_cnt             # E[x^2] per channel
        # Guard against tiny negative variance from E[x^2]-E[x]^2 cancellation.
        var_row = jnp.maximum(ex2_row - mean_row * mean_row, 0.0)
        scale_row = g_ref[...] * jax.lax.rsqrt(var_row + BN_EPS)
        shift_row = b_ref[...] - mean_row * scale_row

        # --- affine + ReLU ---------------------------------------------------
        return jnp.maximum(acc * scale_row + shift_row, 0.0)       # (N*H, WC) f32

    # Stage 1: conv1 -> BN1 -> ReLU.  Interior store is sublane-aligned (row 8).
    xpad_ref[:, BASE:BASE + H, :] = x_ref[...].astype(xpad_ref.dtype)
    y1 = conv_bn_relu(m1_ref, g1_ref, b1_ref)

    # Stage 2: conv2 -> BN2 -> ReLU (halo rows are still zero; only the
    # interior is overwritten).
    xpad_ref[:, BASE:BASE + H, :] = y1.reshape(N, H, WC).astype(xpad_ref.dtype)
    y2 = conv_bn_relu(m2_ref, g2_ref, b2_ref)

    # Residual add: re-read x here (VMEM vld is cheap) instead of holding it
    # live in vregs across both stages.  Single lane-dense fused store.
    out_ref[...] = (x_ref[...] + y2.reshape(N, H, WC)).astype(out_ref.dtype)


# --------------------------------------------------------------------------
# Wrapper-side layout plumbing (weight folding into block-Toeplitz blocks)
# --------------------------------------------------------------------------
def _fold_conv_weight(w_oihw, W):
    """OIHW (Cout, Cin, 3, 3) -> per-kh block-Toeplitz (3, W*C, W*C) over W.

    M[kh, wi*C + ci, wo*C + co] = w[co, ci, kh, wi - wo + 1], zero when the kw
    tap falls outside [0, 3) -- this realizes the W-direction zero padding.
    """
    C = w_oihw.shape[0]
    w_hwio = jnp.transpose(w_oihw, (2, 3, 1, 0))             # (3, 3, Cin, Cout)
    wi = jnp.arange(W)[:, None]
    wo = jnp.arange(W)[None, :]
    kw = wi - wo + 1                                         # (W, W)
    valid = ((kw >= 0) & (kw <= 2)).astype(w_hwio.dtype)
    blocks = w_hwio[:, jnp.clip(kw, 0, 2), :, :]             # (3, W, W, Cin, Cout)
    blocks = blocks * valid[None, :, :, None, None]
    m = jnp.transpose(blocks, (0, 1, 3, 2, 4))               # (3, W, Cin, W, Cout)
    return m.reshape(3, W * C, W * C)


def init_resblock_params(key, nf):
    """Deterministic synthetic parameters matching ResBlock(nf) shapes."""
    k1, k2 = jax.random.split(key)
    return {
        # Conv2d weights in PyTorch OIHW layout: (nf, nf, 3, 3), bias=False.
        "w1": jax.random.normal(k1, (nf, nf, 3, 3), jnp.float32) * 0.1,
        "w2": jax.random.normal(k2, (nf, nf, 3, 3), jnp.float32) * 0.1,
        # BatchNorm2d affine params (nontrivial, deterministic).
        "gamma1": 1.0 + 0.05 * jnp.arange(nf, dtype=jnp.float32),
        "beta1": 0.01 * jnp.arange(nf, dtype=jnp.float32),
        "gamma2": 1.0 - 0.03 * jnp.arange(nf, dtype=jnp.float32),
        "beta2": -0.02 * jnp.arange(nf, dtype=jnp.float32),
    }


@jax.jit
def resblock_forward(x_nchw, params):
    """x + conv2(conv1(x)); input/output in NCHW like the PyTorch module."""
    N, C, H, W = x_nchw.shape
    WC = W * C
    # Lane-dense layout assumptions (demo: W*C = 128).
    # TODO(synk): for W*C not a multiple of 128, pad the lane dim explicitly;
    # for non-power-of-two W, replace the roll-tree channel reduction.
    assert WC % 128 == 0, "last (lane) dim W*C must be a multiple of 128"
    assert W & (W - 1) == 0, "W must be a power of two for the roll reduction"

    # Layout plumbing: NCHW -> NHWC -> lane-dense (N, H, W*C) rows.
    x_rows = jnp.transpose(x_nchw, (0, 2, 3, 1)).reshape(N, H, WC)

    # Fold the 3x3 convs into per-kh block-Toeplitz matmul operands (bf16).
    m1 = _fold_conv_weight(params["w1"], W).astype(MXU_DTYPE)
    m2 = _fold_conv_weight(params["w2"], W).astype(MXU_DTYPE)

    # Per-channel affine params tiled per column (column j -> channel j % C).
    g1 = jnp.tile(params["gamma1"].reshape(1, C), (1, W)).astype(jnp.float32)
    b1 = jnp.tile(params["beta1"].reshape(1, C), (1, W)).astype(jnp.float32)
    g2 = jnp.tile(params["gamma2"].reshape(1, C), (1, W)).astype(jnp.float32)
    b2 = jnp.tile(params["beta2"].reshape(1, C), (1, W)).astype(jnp.float32)

    kernel = functools.partial(_resblock_kernel, N=N, H=H, W=W, C=C)
    out_rows = pl.pallas_call(
        kernel,
        out_shape=jax.ShapeDtypeStruct((N, H, WC), x_nchw.dtype),
        scratch_shapes=[pltpu.VMEM((N, H + 2 * BASE, WC), MXU_DTYPE)],
        # Explicit scoped-VMEM budget (default is 16 MiB on v5e, 32 MiB on
        # v6e/v7x); 32 MiB is far above the demo's live set and safe on all
        # current generations.
        compiler_params=pltpu.CompilerParams(
            vmem_limit_bytes=32 * 1024 * 1024),
    )(x_rows, m1, m2, g1, b1, g2, b2)

    return jnp.transpose(out_rows.reshape(N, H, W, C), (0, 3, 1, 2))


# --------------------------------------------------------------------------
# Pure-JAX reference (float32) for the correctness check
# --------------------------------------------------------------------------
def _ref_conv_bn_relu(x_nhwc, w_hwio, gamma, beta, eps=BN_EPS):
    y = jax.lax.conv_general_dilated(
        x_nhwc, w_hwio, window_strides=(1, 1), padding="SAME",
        dimension_numbers=("NHWC", "HWIO", "NHWC"))
    mean = jnp.mean(y, axis=(0, 1, 2), keepdims=True)
    var = jnp.mean((y - mean) ** 2, axis=(0, 1, 2), keepdims=True)
    y = (y - mean) * (gamma * jax.lax.rsqrt(var + eps)) + beta
    return jnp.maximum(y, 0.0)


def _ref_resblock(x_nchw, params):
    x = jnp.transpose(x_nchw, (0, 2, 3, 1))
    w1 = jnp.transpose(params["w1"], (2, 3, 1, 0))
    w2 = jnp.transpose(params["w2"], (2, 3, 1, 0))
    y = _ref_conv_bn_relu(x, w1, params["gamma1"], params["beta1"])
    y = x + _ref_conv_bn_relu(y, w2, params["gamma2"], params["beta2"])
    return jnp.transpose(y, (0, 3, 1, 2))


if __name__ == "__main__":
    key = jax.random.PRNGKey(0)
    kx, kp = jax.random.split(key)

    N, C, H, W = 2, 8, 16, 16            # nf = 8; W*C = 128 -> fully lane-dense
    x = jax.random.normal(kx, (N, C, H, W), jnp.float32)
    params = init_resblock_params(kp, C)

    out = jax.block_until_ready(resblock_forward(x, params))
    assert out.shape == (N, C, H, W) and out.dtype == jnp.float32

    ref = jax.block_until_ready(_ref_resblock(x, params))
    # bf16 MXU operands (f32 accumulation) -> compare at bf16-level tolerance.
    assert jnp.allclose(out, ref, rtol=2e-2, atol=2e-2), "mismatch vs JAX reference"

    print("KERNEL_OK")
</pallas_src>

<mosaic_0001>
module attributes {stable_mosaic.version = 11 : i64} {
  func.func @_resblock_kernel(%arg0: memref<2x16x128xf32, #tpu.memory_space<vmem>>, %arg1: memref<3x128x128xbf16, #tpu.memory_space<vmem>>, %arg2: memref<3x128x128xbf16, #tpu.memory_space<vmem>>, %arg3: memref<1x128xf32, #tpu.memory_space<vmem>>, %arg4: memref<1x128xf32, #tpu.memory_space<vmem>>, %arg5: memref<1x128xf32, #tpu.memory_space<vmem>>, %arg6: memref<1x128xf32, #tpu.memory_space<vmem>>, %arg7: memref<2x16x128xf32, #tpu.memory_space<vmem>>, %arg8: memref<2x32x128xbf16, #tpu.memory_space<vmem>>) attributes {dimension_semantics = [], scalar_prefetch = 0 : i64, scratch_operands = 1 : i64, tpu.core_type = #tpu.core_type<tc>} {
    %cst = arith.constant 0.000000e+00 : bf16
    %0 = vector.broadcast %cst : bf16 to vector<2x8x128xbf16>
    %c0 = arith.constant 0 : index
    %c0_0 = arith.constant 0 : index
    %c0_1 = arith.constant 0 : index
    %1 = vector.load %arg8[%c0, %c0_0, %c0_1] : memref<2x32x128xbf16, #tpu.memory_space<vmem>>, vector<2x8x128xbf16>
    tpu.vector_store %arg8[%c0, %c0_0, %c0_1], %0 {strides = array<i32>} : memref<2x32x128xbf16, #tpu.memory_space<vmem>>, vector<2x8x128xbf16>,
    %c0_2 = arith.constant 0 : index
    %c24 = arith.constant 24 : index
    %c0_3 = arith.constant 0 : index
    %2 = vector.load %arg8[%c0_2, %c24, %c0_3] : memref<2x32x128xbf16, #tpu.memory_space<vmem>>, vector<2x8x128xbf16>
    tpu.vector_store %arg8[%c0_2, %c24, %c0_3], %0 {strides = array<i32>} : memref<2x32x128xbf16, #tpu.memory_space<vmem>>, vector<2x8x128xbf16>,
    %c0_4 = arith.constant 0 : index
    %c0_5 = arith.constant 0 : index
    %c0_6 = arith.constant 0 : index
    %3 = vector.load %arg0[%c0_4, %c0_5, %c0_6] : memref<2x16x128xf32, #tpu.memory_space<vmem>>, vector<2x16x128xf32>
    %4 = arith.truncf %3 : vector<2x16x128xf32> to vector<2x16x128xbf16>
    %c0_7 = arith.constant 0 : index
    %c8 = arith.constant 8 : index
    %c0_8 = arith.constant 0 : index
    %5 = vector.load %arg8[%c0_7, %c8, %c0_8] : memref<2x32x128xbf16, #tpu.memory_space<vmem>>, vector<2x16x128xbf16>
    tpu.vector_store %arg8[%c0_7, %c8, %c0_8], %4 {strides = array<i32>} : memref<2x32x128xbf16, #tpu.memory_space<vmem>>, vector<2x16x128xbf16>,
    %c0_9 = arith.constant 0 : index
    %c7 = arith.constant 7 : index
    %c0_10 = arith.constant 0 : index
    %6 = vector.load %arg8[%c0_9, %c7, %c0_10] : memref<2x32x128xbf16, #tpu.memory_space<vmem>>, vector<2x16x128xbf16>
    %7 = vector.shape_cast %6 : vector<2x16x128xbf16> to vector<32x128xbf16>
    %c0_11 = arith.constant 0 : index
    %c0_12 = arith.constant 0 : index
    %c0_13 = arith.constant 0 : index
    %8 = vector.load %arg1[%c0_11, %c0_12, %c0_13] : memref<3x128x128xbf16, #tpu.memory_space<vmem>>, vector<1x128x128xbf16>
    %9 = vector.shape_cast %8 : vector<1x128x128xbf16> to vector<128x128xbf16>
    %cst_14 = arith.constant dense<0.000000e+00> : vector<32x128xf32>
    %10 = tpu.matmul %7, %9, %cst_14 {dimension_numbers = #tpu.dot_dimension_numbers<[1], [0], [0], [1], [0, 0, 1, 1], [], []>} : vector<32x128xbf16>, vector<128x128xbf16>, vector<32x128xf32> -> vector<32x128xf32>
    %c0_15 = arith.constant 0 : index
    %c8_16 = arith.constant 8 : index
    %c0_17 = arith.constant 0 : index
    %11 = vector.load %arg8[%c0_15, %c8_16, %c0_17] : memref<2x32x128xbf16, #tpu.memory_space<vmem>>, vector<2x16x128xbf16>
    %12 = vector.shape_cast %11 : vector<2x16x128xbf16> to vector<32x128xbf16>
    %c1 = arith.constant 1 : index
    %c0_18 = arith.constant 0 : index
    %c0_19 = arith.constant 0 : index
    %13 = vector.load %arg1[%c1, %c0_18, %c0_19] : memref<3x128x128xbf16, #tpu.memory_space<vmem>>, vector<1x128x128xbf16>
    %14 = vector.shape_cast %13 : vector<1x128x128xbf16> to vector<128x128xbf16>
    %cst_20 = arith.constant dense<0.000000e+00> : vector<32x128xf32>
    %15 = tpu.matmul %12, %14, %cst_20 {dimension_numbers = #tpu.dot_dimension_numbers<[1], [0], [0], [1], [0, 0, 1, 1], [], []>} : vector<32x128xbf16>, vector<128x128xbf16>, vector<32x128xf32> -> vector<32x128xf32>
    %16 = arith.addf %10, %15 : vector<32x128xf32>
    %c0_21 = arith.constant 0 : index
    %c9 = arith.constant 9 : index
    %c0_22 = arith.constant 0 : index
    %17 = vector.load %arg8[%c0_21, %c9, %c0_22] : memref<2x32x128xbf16, #tpu.memory_space<vmem>>, vector<2x16x128xbf16>
    %18 = vector.shape_cast %17 : vector<2x16x128xbf16> to vector<32x128xbf16>
    %c2 = arith.constant 2 : index
    %c0_23 = arith.constant 0 : index
    %c0_24 = arith.constant 0 : index
    %19 = vector.load %arg1[%c2, %c0_23, %c0_24] : memref<3x128x128xbf16, #tpu.memory_space<vmem>>, vector<1x128x128xbf16>
    %20 = vector.shape_cast %19 : vector<1x128x128xbf16> to vector<128x128xbf16>
    %cst_25 = arith.constant dense<0.000000e+00> : vector<32x128xf32>
    %21 = tpu.matmul %18, %20, %cst_25 {dimension_numbers = #tpu.dot_dimension_numbers<[1], [0], [0], [1], [0, 0, 1, 1], [], []>} : vector<32x128xbf16>, vector<128x128xbf16>, vector<32x128xf32> -> vector<32x128xf32>
    %22 = arith.addf %16, %21 : vector<32x128xf32>
    %cst_26 = arith.constant dense<0.000000e+00> : vector<128xf32>
    %23 = vector.multi_reduction <add>, %22, %cst_26 [0] : vector<32x128xf32> to vector<128xf32>
    %24 = vector.shape_cast %23 : vector<128xf32> to vector<1x128xf32>
    %25 = arith.mulf %22, %22 : vector<32x128xf32>
    %cst_27 = arith.constant dense<0.000000e+00> : vector<128xf32>
    %26 = vector.multi_reduction <add>, %25, %cst_27 [0] : vector<32x128xf32> to vector<128xf32>
    %27 = vector.shape_cast %26 : vector<128xf32> to vector<1x128xf32>
    %c8_i32 = arith.constant 8 : i32
    %28 = tpu.dynamic_rotate %24 by %c8_i32 dim 1 : vector<1x128xf32>, i32 -> vector<1x128xf32>
    %29 = arith.addf %24, %28 : vector<1x128xf32>
    %c16_i32 = arith.constant 16 : i32
    %30 = tpu.dynamic_rotate %29 by %c16_i32 dim 1 : vector<1x128xf32>, i32 -> vector<1x128xf32>
    %31 = arith.addf %29, %30 : vector<1x128xf32>
    %c32_i32 = arith.constant 32 : i32
    %32 = tpu.dynamic_rotate %31 by %c32_i32 dim 1 : vector<1x128xf32>, i32 -> vector<1x128xf32>
    %33 = arith.addf %31, %32 : vector<1x128xf32>
    %c64_i32 = arith.constant 64 : i32
    %34 = tpu.dynamic_rotate %33 by %c64_i32 dim 1 : vector<1x128xf32>, i32 -> vector<1x128xf32>
    %35 = arith.addf %33, %34 : vector<1x128xf32>
    %cst_28 = arith.constant 0.001953125 : f32
    %36 = vector.broadcast %cst_28 : f32 to vector<1x128xf32>
    %37 = arith.mulf %35, %36 : vector<1x128xf32>
    %c8_i32_29 = arith.constant 8 : i32
    %38 = tpu.dynamic_rotate %27 by %c8_i32_29 dim 1 : vector<1x128xf32>, i32 -> vector<1x128xf32>
    %39 = arith.addf %27, %38 : vector<1x128xf32>
    %c16_i32_30 = arith.constant 16 : i32
    %40 = tpu.dynamic_rotate %39 by %c16_i32_30 dim 1 : vector<1x128xf32>, i32 -> vector<1x128xf32>
    %41 = arith.addf %39, %40 : vector<1x128xf32>
    %c32_i32_31 = arith.constant 32 : i32
    %42 = tpu.dynamic_rotate %41 by %c32_i32_31 dim 1 : vector<1x128xf32>, i32 -> vector<1x128xf32>
    %43 = arith.addf %41, %42 : vector<1x128xf32>
    %c64_i32_32 = arith.constant 64 : i32
    %44 = tpu.dynamic_rotate %43 by %c64_i32_32 dim 1 : vector<1x128xf32>, i32 -> vector<1x128xf32>
    %45 = arith.addf %43, %44 : vector<1x128xf32>
    %cst_33 = arith.constant 0.001953125 : f32
    %46 = vector.broadcast %cst_33 : f32 to vector<1x128xf32>
    %47 = arith.mulf %45, %46 : vector<1x128xf32>
    %48 = arith.mulf %37, %37 : vector<1x128xf32>
    %49 = arith.subf %47, %48 : vector<1x128xf32>
    %cst_34 = arith.constant 0.000000e+00 : f32
    %50 = vector.broadcast %cst_34 : f32 to vector<1x128xf32>
    %51 = arith.maximumf %49, %50 : vector<1x128xf32>
    %c0_35 = arith.constant 0 : index
    %c0_36 = arith.constant 0 : index
    %52 = vector.load %arg3[%c0_35, %c0_36] : memref<1x128xf32, #tpu.memory_space<vmem>>, vector<1x128xf32>
    %cst_37 = arith.constant 9.99999974E-6 : f32
    %53 = vector.broadcast %cst_37 : f32 to vector<1x128xf32>
    %54 = arith.addf %51, %53 : vector<1x128xf32>
    %55 = math.rsqrt %54 : vector<1x128xf32>
    %56 = arith.mulf %52, %55 : vector<1x128xf32>
    %c0_38 = arith.constant 0 : index
    %c0_39 = arith.constant 0 : index
    %57 = vector.load %arg4[%c0_38, %c0_39] : memref<1x128xf32, #tpu.memory_space<vmem>>, vector<1x128xf32>
    %58 = arith.mulf %37, %56 : vector<1x128xf32>
    %59 = arith.subf %57, %58 : vector<1x128xf32>
    %60 = vector.broadcast %56 : vector<1x128xf32> to vector<32x128xf32>
    %61 = arith.mulf %22, %60 : vector<32x128xf32>
    %62 = vector.broadcast %59 : vector<1x128xf32> to vector<32x128xf32>
    %63 = arith.addf %61, %62 : vector<32x128xf32>
    %cst_40 = arith.constant 0.000000e+00 : f32
    %64 = vector.broadcast %cst_40 : f32 to vector<32x128xf32>
    %65 = arith.maximumf %63, %64 : vector<32x128xf32>
    %66 = vector.shape_cast %65 : vector<32x128xf32> to vector<2x16x128xf32>
    %67 = arith.truncf %66 : vector<2x16x128xf32> to vector<2x16x128xbf16>
    %c0_41 = arith.constant 0 : index
    %c8_42 = arith.constant 8 : index
    %c0_43 = arith.constant 0 : index
    %68 = vector.load %arg8[%c0_41, %c8_42, %c0_43] : memref<2x32x128xbf16, #tpu.memory_space<vmem>>, vector<2x16x128xbf16>
    tpu.vector_store %arg8[%c0_41, %c8_42, %c0_43], %67 {strides = array<i32>} : memref<2x32x128xbf16, #tpu.memory_space<vmem>>, vector<2x16x128xbf16>,
    %c0_44 = arith.constant 0 : index
    %c7_45 = arith.constant 7 : index
    %c0_46 = arith.constant 0 : index
    %69 = vector.load %arg8[%c0_44, %c7_45, %c0_46] : memref<2x32x128xbf16, #tpu.memory_space<vmem>>, vector<2x16x128xbf16>
    %70 = vector.shape_cast %69 : vector<2x16x128xbf16> to vector<32x128xbf16>
    %c0_47 = arith.constant 0 : index
    %c0_48 = arith.constant 0 : index
    %c0_49 = arith.constant 0 : index
    %71 = vector.load %arg2[%c0_47, %c0_48, %c0_49] : memref<3x128x128xbf16, #tpu.memory_space<vmem>>, vector<1x128x128xbf16>
    %72 = vector.shape_cast %71 : vector<1x128x128xbf16> to vector<128x128xbf16>
    %cst_50 = arith.constant dense<0.000000e+00> : vector<32x128xf32>
    %73 = tpu.matmul %70, %72, %cst_50 {dimension_numbers = #tpu.dot_dimension_numbers<[1], [0], [0], [1], [0, 0, 1, 1], [], []>} : vector<32x128xbf16>, vector<128x128xbf16>, vector<32x128xf32> -> vector<32x128xf32>
    %c0_51 = arith.constant 0 : index
    %c8_52 = arith.constant 8 : index
    %c0_53 = arith.constant 0 : index
    %74 = vector.load %arg8[%c0_51, %c8_52, %c0_53] : memref<2x32x128xbf16, #tpu.memory_space<vmem>>, vector<2x16x128xbf16>
    %75 = vector.shape_cast %74 : vector<2x16x128xbf16> to vector<32x128xbf16>
    %c1_54 = arith.constant 1 : index
    %c0_55 = arith.constant 0 : index
    %c0_56 = arith.constant 0 : index
    %76 = vector.load %arg2[%c1_54, %c0_55, %c0_56] : memref<3x128x128xbf16, #tpu.memory_space<vmem>>, vector<1x128x128xbf16>
    %77 = vector.shape_cast %76 : vector<1x128x128xbf16> to vector<128x128xbf16>
    %cst_57 = arith.constant dense<0.000000e+00> : vector<32x128xf32>
    %78 = tpu.matmul %75, %77, %cst_57 {dimension_numbers = #tpu.dot_dimension_numbers<[1], [0], [0], [1], [0, 0, 1, 1], [], []>} : vector<32x128xbf16>, vector<128x128xbf16>, vector<32x128xf32> -> vector<32x128xf32>
    %79 = arith.addf %73, %78 : vector<32x128xf32>
    %c0_58 = arith.constant 0 : index
    %c9_59 = arith.constant 9 : index
    %c0_60 = arith.constant 0 : index
    %80 = vector.load %arg8[%c0_58, %c9_59, %c0_60] : memref<2x32x128xbf16, #tpu.memory_space<vmem>>, vector<2x16x128xbf16>
    %81 = vector.shape_cast %80 : vector<2x16x128xbf16> to vector<32x128xbf16>
    %c2_61 = arith.constant 2 : index
    %c0_62 = arith.constant 0 : index
    %c0_63 = arith.constant 0 : index
    %82 = vector.load %arg2[%c2_61, %c0_62, %c0_63] : memref<3x128x128xbf16, #tpu.memory_space<vmem>>, vector<1x128x128xbf16>
    %83 = vector.shape_cast %82 : vector<1x128x128xbf16> to vector<128x128xbf16>
    %cst_64 = arith.constant dense<0.000000e+00> : vector<32x128xf32>
    %84 = tpu.matmul %81, %83, %cst_64 {dimension_numbers = #tpu.dot_dimension_numbers<[1], [0], [0], [1], [0, 0, 1, 1], [], []>} : vector<32x128xbf16>, vector<128x128xbf16>, vector<32x128xf32> -> vector<32x128xf32>
    %85 = arith.addf %79, %84 : vector<32x128xf32>
    %cst_65 = arith.constant dense<0.000000e+00> : vector<128xf32>
    %86 = vector.multi_reduction <add>, %85, %cst_65 [0] : vector<32x128xf32> to vector<128xf32>
    %87 = vector.shape_cast %86 : vector<128xf32> to vector<1x128xf32>
    %88 = arith.mulf %85, %85 : vector<32x128xf32>
    %cst_66 = arith.constant dense<0.000000e+00> : vector<128xf32>
    %89 = vector.multi_reduction <add>, %88, %cst_66 [0] : vector<32x128xf32> to vector<128xf32>
    %90 = vector.shape_cast %89 : vector<128xf32> to vector<1x128xf32>
    %c8_i32_67 = arith.constant 8 : i32
    %91 = tpu.dynamic_rotate %87 by %c8_i32_67 dim 1 : vector<1x128xf32>, i32 -> vector<1x128xf32>
    %92 = arith.addf %87, %91 : vector<1x128xf32>
    %c16_i32_68 = arith.constant 16 : i32
    %93 = tpu.dynamic_rotate %92 by %c16_i32_68 dim 1 : vector<1x128xf32>, i32 -> vector<1x128xf32>
    %94 = arith.addf %92, %93 : vector<1x128xf32>
    %c32_i32_69 = arith.constant 32 : i32
    %95 = tpu.dynamic_rotate %94 by %c32_i32_69 dim 1 : vector<1x128xf32>, i32 -> vector<1x128xf32>
    %96 = arith.addf %94, %95 : vector<1x128xf32>
    %c64_i32_70 = arith.constant 64 : i32
    %97 = tpu.dynamic_rotate %96 by %c64_i32_70 dim 1 : vector<1x128xf32>, i32 -> vector<1x128xf32>
    %98 = arith.addf %96, %97 : vector<1x128xf32>
    %cst_71 = arith.constant 0.001953125 : f32
    %99 = vector.broadcast %cst_71 : f32 to vector<1x128xf32>
    %100 = arith.mulf %98, %99 : vector<1x128xf32>
    %c8_i32_72 = arith.constant 8 : i32
    %101 = tpu.dynamic_rotate %90 by %c8_i32_72 dim 1 : vector<1x128xf32>, i32 -> vector<1x128xf32>
    %102 = arith.addf %90, %101 : vector<1x128xf32>
    %c16_i32_73 = arith.constant 16 : i32
    %103 = tpu.dynamic_rotate %102 by %c16_i32_73 dim 1 : vector<1x128xf32>, i32 -> vector<1x128xf32>
    %104 = arith.addf %102, %103 : vector<1x128xf32>
    %c32_i32_74 = arith.constant 32 : i32
    %105 = tpu.dynamic_rotate %104 by %c32_i32_74 dim 1 : vector<1x128xf32>, i32 -> vector<1x128xf32>
    %106 = arith.addf %104, %105 : vector<1x128xf32>
    %c64_i32_75 = arith.constant 64 : i32
    %107 = tpu.dynamic_rotate %106 by %c64_i32_75 dim 1 : vector<1x128xf32>, i32 -> vector<1x128xf32>
    %108 = arith.addf %106, %107 : vector<1x128xf32>
    %cst_76 = arith.constant 0.001953125 : f32
    %109 = vector.broadcast %cst_76 : f32 to vector<1x128xf32>
    %110 = arith.mulf %108, %109 : vector<1x128xf32>
    %111 = arith.mulf %100, %100 : vector<1x128xf32>
    %112 = arith.subf %110, %111 : vector<1x128xf32>
    %cst_77 = arith.constant 0.000000e+00 : f32
    %113 = vector.broadcast %cst_77 : f32 to vector<1x128xf32>
    %114 = arith.maximumf %112, %113 : vector<1x128xf32>
    %c0_78 = arith.constant 0 : index
    %c0_79 = arith.constant 0 : index
    %115 = vector.load %arg5[%c0_78, %c0_79] : memref<1x128xf32, #tpu.memory_space<vmem>>, vector<1x128xf32>
    %cst_80 = arith.constant 9.99999974E-6 : f32
    %116 = vector.broadcast %cst_80 : f32 to vector<1x128xf32>
    %117 = arith.addf %114, %116 : vector<1x128xf32>
    %118 = math.rsqrt %117 : vector<1x128xf32>
    %119 = arith.mulf %115, %118 : vector<1x128xf32>
    %c0_81 = arith.constant 0 : index
    %c0_82 = arith.constant 0 : index
    %120 = vector.load %arg6[%c0_81, %c0_82] : memref<1x128xf32, #tpu.memory_space<vmem>>, vector<1x128xf32>
    %121 = arith.mulf %100, %119 : vector<1x128xf32>
    %122 = arith.subf %120, %121 : vector<1x128xf32>
    %123 = vector.broadcast %119 : vector<1x128xf32> to vector<32x128xf32>
    %124 = arith.mulf %85, %123 : vector<32x128xf32>
    %125 = vector.broadcast %122 : vector<1x128xf32> to vector<32x128xf32>
    %126 = arith.addf %124, %125 : vector<32x128xf32>
    %cst_83 = arith.constant 0.000000e+00 : f32
    %127 = vector.broadcast %cst_83 : f32 to vector<32x128xf32>
    %128 = arith.maximumf %126, %127 : vector<32x128xf32>
    %c0_84 = arith.constant 0 : index
    %c0_85 = arith.constant 0 : index
    %c0_86 = arith.constant 0 : index
    %129 = vector.load %arg0[%c0_84, %c0_85, %c0_86] : memref<2x16x128xf32, #tpu.memory_space<vmem>>, vector<2x16x128xf32>
    %130 = vector.shape_cast %128 : vector<32x128xf32> to vector<2x16x128xf32>
    %131 = arith.addf %129, %130 : vector<2x16x128xf32>
    %c0_87 = arith.constant 0 : index
    %c0_88 = arith.constant 0 : index
    %c0_89 = arith.constant 0 : index
    %132 = vector.load %arg7[%c0_87, %c0_88, %c0_89] : memref<2x16x128xf32, #tpu.memory_space<vmem>>, vector<2x16x128xf32>
    tpu.vector_store %arg7[%c0_87, %c0_88, %c0_89], %131 {strides = array<i32>} : memref<2x16x128xf32, #tpu.memory_space<vmem>>, vector<2x16x128xf32>,
    return
  }
}

</mosaic_0001>

<bundles_post_ra>
// kernel: resblock_forward.1
= control target key start
LH: loop header
LB: loop body
LE: loop exit
PB: predicated region body
PF: predicated region fallthrough
CT: control target
= control target key end

     0   :  { %v1485_v1 = vmov 0   ;;  %vm110_vm0 = vcmask 1043456   ;;  %vm51_vm1 = vsmask.f32 4352  ;;  %vm332_vm2 = vsmask.f32 3328  ;;  %s1823_s1 = inlined_call_operand.vmem [shape: bf16[3,128,128], index: 1, kind: input, shape index: {}]   ;;  %s1824_s0 = inlined_call_operand.vmem [shape: f32[2,16,128], index: 0, kind: input, shape index: {}]   ;;  %s1825_s2 = inlined_call_operand.vmem [shape: bf16[3,128,128], index: 2, kind: input, shape index: {}]   ;;  %s1826_s3 = inlined_call_operand.vmem [shape: f32[1,128], index: 3, kind: input, shape index: {}]   ;;  %s1827_s4 = inlined_call_operand.vmem [shape: f32[1,128], index: 4, kind: input, shape index: {}]   ;;  %s1828_s5 = inlined_call_operand.vmem [shape: f32[1,128], index: 5, kind: input, shape index: {}]   ;;  %s1829_s6 = inlined_call_operand.vmem [shape: f32[1,128], index: 6, kind: input, shape index: {}]   ;;  %s1830_s7 = inlined_call_operand.vmem [shape: f32[2,16,128], index: 7, kind: output, shape index: {}]  }
   0x1   :  { %v1429_v0 = vld [vmem:[%s1823_s1 + $0x40] sm:$0xff]   ;;  %27 = vst [vmem:[#allocation2] sm:$0xf] %v1485_v1  ;;  %28 = vst [vmem:[#allocation2 + $0x10] sm:$0xf] %v1485_v1  ;;  %v1430_v2 = vld [vmem:[%s1823_s1 + $0x48] sm:$0xff]  }
   0x2   :  { %29 = vst [vmem:[#allocation2 + $0x8] sm:$0xf0] %v1485_v1  ;;  %30 = vst [vmem:[#allocation2 + $0x18] sm:$0xf0] %v1485_v1  ;;  %1288 = vmatprep.subr.bf16.mxu0 %v1429_v0  ;;  %v1431_v3 = vld [vmem:[%s1823_s1 + $0x50] sm:$0xff]   ;;  %v1432_v4 = vld [vmem:[%s1823_s1 + $0x58] sm:$0xff]  }
   0x3   :  { %1289 = vmatpush3.bf16.msra.mxu0 %v1429_v0  ;;  %v31_v5 = vld [vmem:[%s1824_s0] sm:$0xff]  ;;  %v32_v6 = vld [vmem:[%s1824_s0 + $0x8] sm:$0xff]  ;;  %v33_v8 = vld [vmem:[%s1824_s0 + $0x10] sm:$0xff]  ;;  %s1487_s11 = smov 16   ;;  %s1488_s12 = smov 32  }
   0x4   :  { %1290 = vmatprep.subr.bf16.mxu0 %v1430_v2  ;;  %v35_v7 = vpack.c.bf16 %v32_v6, %v31_v5  ;;  %v34_v9 = vld [vmem:[%s1824_s0 + $0x18] sm:$0xff]  ;;  %v1433_v12 = vld [vmem:[%s1823_s1 + $0x60] sm:$0xff]   ;;  %v1434_v14 = vld [vmem:[%s1823_s1 + $0x68] sm:$0xff]   ;;  %s1489_s13 = smov 64  }
   0x5   :  { %v36_v11 = vpack.c.bf16 %v34_v9, %v33_v8  ;;  %v1435_v15 = vld [vmem:[%s1823_s1 + $0x70] sm:$0xff]   ;;  %v1436_v25 = vld [vmem:[%s1823_s1 + $0x78] sm:$0xff]   ;;  %v1437_v33 = vld [vmem:[%s1823_s1] sm:$0xff]  }
   0x6   :  { %v39_v10 = vrot.slane %v35_v7, 4  ;;  %v1438_v39 = vld [vmem:[%s1823_s1 + $0x8] sm:$0xff]   ;;  %v1439_v41 = vld [vmem:[%s1823_s1 + $0x10] sm:$0xff]   ;;  %v1440_v42 = vld [vmem:[%s1823_s1 + $0x18] sm:$0xff]  }
   0x7   :  { %1291 = vmatpush3.bf16.msra.mxu0 %v1430_v2  ;;  %v40_v13 = vrot.slane %v36_v11, 4  ;;  %v1441_v43 = vld [vmem:[%s1823_s1 + $0x20] sm:$0xff]   ;;  %v1442_v44 = vld [vmem:[%s1823_s1 + $0x28] sm:$0xff]   ;;  %v1443_v51 = vld [vmem:[%s1823_s1 + $0x30] sm:$0xff]  }
   0x8   :  { %1292 = vmatprep.subr.bf16.mxu0 %v1431_v3  ;;  %43 = vst [vmem:[#allocation2 + $0x8] ss:$-4 sps:$4 sm:$0xff] %v39_v10   ;;  %v1444_v60 = vld [vmem:[%s1823_s1 + $0x38] sm:$0xff]   ;;  %v1446_v7 = vld [vmem:[%s1823_s1 + $0x88] sm:$0xff]   ;;  %v1447_v9 = vld [vmem:[%s1823_s1 + $0x90] sm:$0xff]  }
   0x9   :  { %45 = vst [vmem:[#allocation2 + $0x18] ss:$-4 sps:$4 sm:$0xff] %v40_v13   ;;  %v1448_v10 = vld [vmem:[%s1823_s1 + $0x98] sm:$0xff]   ;;  %v1449_v11 = vld [vmem:[%s1823_s1 + $0xa0] sm:$0xff]  }
   0xb   :  { %1293 = vmatpush3.bf16.msra.mxu0 %v1431_v3  ;;  %v1445_v3 = vld [vmem:[%s1823_s1 + $0x80] sm:$0xff]  }
   0xc   :  { %1294 = vmatprep.subr.bf16.mxu0 %v1432_v4 }
   0xf   :  { %1295 = vmatpush3.bf16.msra.mxu0 %v1432_v4  ;;  %v48_v16 = vld [vmem:[#allocation2 + $0x8] sm:$0xf]  ;;  %v1563_v17 = vld [vmem:[#allocation2] sm:$0xf0] }
  0x10   :  { %1296 = vmatprep.subr.bf16.mxu0 %v1433_v12  ;;  %v47_v18 = vld [vmem:[#allocation2] sm:$0xf8]  ;;  %v111_v19 = vrot.slane %v1563_v17, 4  ;;  %v112_v20 = vrot.slane %v48_v16, 4  ;;  %v61_v23 = vshrl.u32 %v48_v16, 16  ;;  %v64_v24 = vshll.u32 %v48_v16, 16 }
  0x11   :  { %v53_v21 = vshrl.u32 %v47_v18, 16  ;;  %v56_v22 = vshll.u32 %v47_v18, 16  ;;  %v50_v27 = vld [vmem:[#allocation2 + $0x18] sm:$0xf]  ;;  %v1570_v28 = vld [vmem:[#allocation2 + $0x10] sm:$0xf0] }
  0x12   :  { %v113_v26 = vsel %vm110_vm0, %v111_v19, %v112_v20  ;;  %v63_v31 = vrot.slane %v61_v23, 3  ;;  %v66_v32 = vrot.slane %v64_v24, 4  ;;  %v114_v34 = vrot.slane %v1570_v28, 4  ;;  %v49_v45 = vld [vmem:[#allocation2 + $0x10] sm:$0xf8]  ;;  %v1452_v23 = vld [vmem:[%s1823_s1 + $0xb8] sm:$0xff]  }
  0x13   :  { %1297 = vmatpush3.bf16.msra.mxu0 %v1433_v12  ;;  %1304 = vmatprep.mubr.bf16.mxu0 %v113_v26  ;;  %v55_v29 = vrot.slane %v53_v21, 3  ;;  %v58_v30 = vrot.slane %v56_v22, 4  ;;  %v115_v35 = vrot.slane %v50_v27, 4  ;;  %v330_v46 = vld [vmem:[#allocation2 + $0x8] sm:$0x1f]  ;;  %v70_v47 = vshrl.u32 %v49_v45, 16 }
  0x14   :  { %1298 = vmatprep.subr.bf16.mxu0 %v1434_v14  ;;  %v67_v37 = vor.u32 %v66_v32, %v63_v31  ;;  %v73_v48 = vshll.u32 %v49_v45, 16  ;;  %v78_v49 = vshrl.u32 %v50_v27, 16  ;;  %v81_v50 = vshll.u32 %v50_v27, 16  ;;  %v1450_v12 = vld [vmem:[%s1823_s1 + $0xa8] sm:$0xff]   ;;  %v331_v13 = vld [vmem:[#allocation2 + $0x18] sm:$0x1f] }
  0x15   :  { %v59_v36 = vor.u32 %v58_v30, %v55_v29  ;;  %v116_v38 = vsel %vm110_vm0, %v114_v34, %v115_v35  ;;  %v334_v52 = vshrl.u32 %v1563_v17, 16  ;;  %v337_v53 = vshll.u32 %v1563_v17, 16  ;;  %v1451_v18 = vld [vmem:[%s1823_s1 + $0xb0] sm:$0xff]   ;;  %s1486_s1 = smov 8  }
  0x16   :  { %v342_v54 = vshrl.u32 %v330_v46, 16  ;;  %v345_v55 = vshll.u32 %v330_v46, 16  ;;  %v72_v56 = vrot.slane %v70_v47, 3  ;;  %v75_v57 = vrot.slane %v73_v48, 4 }
  0x17   :  { %1299 = vmatpush3.bf16.msra.mxu0 %v1434_v14  ;;  %v68_v40 = vsel %vm51_vm1, %v59_v36, %v67_v37  ;;  %v80_v58 = vrot.slane %v78_v49, 3  ;;  %v83_v59 = vrot.slane %v81_v50, 4  ;;  %v336_v61 = vrot.slane %v334_v52, 4 }
  0x18   :  { %1300 = vmatprep.subr.bf16.mxu0 %v1435_v15  ;;  %v339_v62 = vrot.slane %v337_v53, 5  ;;  %v344_v63 = vrot.slane %v342_v54, 4  ;;  %v347_v0 = vrot.slane %v345_v55, 5  ;;  %v76_v1 = vor.u32 %v75_v57, %v72_v56 }
  0x19   :  { %v84_v2 = vor.u32 %v83_v59, %v80_v58  ;;  %v351_v14 = vshrl.u32 %v1570_v28, 16  ;;  %v359_v16 = vshrl.u32 %v331_v13, 16  ;;  %v362_v17 = vshll.u32 %v331_v13, 16 }
  0x1a   :  { %v340_v4 = vor.u32 %v339_v62, %v336_v61  ;;  %v348_v5 = vor.u32 %v347_v0, %v344_v63 }
  0x1b   :  { %1301 = vmatpush3.bf16.msra.mxu0 %v1435_v15  ;;  %v85_v6 = vsel %vm51_vm1, %v76_v1, %v84_v2  ;;  %v354_v15 = vshll.u32 %v1570_v28, 16  ;;  %v353_v19 = vrot.slane %v351_v14, 4  ;;  %v361_v21 = vrot.slane %v359_v16, 4  ;;  %v1453_v1 = vld [vmem:[%s1825_s2 + $0x40] sm:$0xff]   ;;  %v1454_v2 = vld [vmem:[%s1825_s2 + $0x48] sm:$0xff]  }
  0x1c   :  { %1302 = vmatprep.subr.bf16.mxu0 %v1436_v25  ;;  %v349_v8 = vsel %vm332_vm2, %v340_v4, %v348_v5  ;;  %v364_v22 = vrot.slane %v362_v17, 5  ;;  %1348 = vmatprep.subr.bf16.mxu1 %v1453_v1  ;;  %v1456_v4 = vld [vmem:[%s1825_s2 + $0x58] sm:$0xff]   ;;  %v1457_v5 = vld [vmem:[%s1825_s2 + $0x60] sm:$0xff]  }
  0x1d   :  { %v356_v20 = vrot.slane %v354_v15, 5  ;;  %1349 = vmatpush3.bf16.msra.mxu1 %v1453_v1 }
  0x1e   :  { %1350 = vmatprep.subr.bf16.mxu1 %v1454_v2 }
  0x1f   :  { %1303 = vmatpush3.bf16.msra.mxu0 %v1436_v25  ;;  %v357_v24 = vor.u32 %v356_v20, %v353_v19  ;;  %v365_v25 = vor.u32 %v364_v22, %v361_v21  ;;  %v546_v20 = vlaneseq  ;;  %v538_v22 = vld [vmem:[%s1826_s3] sm:$0x1] }
  0x20   :  { %1308 = vmatprep.subr.bf16.mxu0 %v1437_v33 }
  0x21   :  { %v366_v26 = vsel %vm332_vm2, %v357_v24, %v365_v25  ;;  %1351 = vmatpush3.bf16.msra.mxu1 %v1454_v2  ;;  %v547_v21 = vshrl.u32 %v546_v20, 7 }
  0x22   :  { %1305 = vmatmul.mubr.bf16.vlgmr.msra.gmra.mrb[0].mxu0 %v116_v38 }
  0x23   :  { %1309 = vmatpush3.bf16.msra.mxu0 %v1437_v33  ;;  %1324 = vmatprep.mubr.bf16.mxu0 %v68_v40 }
  0x24   :  { %1310 = vmatprep.subr.bf16.mxu0 %v1438_v39 }
  0x27   :  { %1311 = vmatpush3.bf16.msra.mxu0 %v1438_v39 }
  0x28   :  { %1312 = vmatprep.subr.bf16.mxu0 %v1439_v41 }
  0x2b   :  { %1313 = vmatpush3.bf16.msra.mxu0 %v1439_v41 }
  0x2c   :  { %1314 = vmatprep.subr.bf16.mxu0 %v1440_v42 }
  0x2f   :  { %1315 = vmatpush3.bf16.msra.mxu0 %v1440_v42 }
  0x30   :  { %1316 = vmatprep.subr.bf16.mxu0 %v1441_v43 }
  0x33   :  { %1317 = vmatpush3.bf16.msra.mxu0 %v1441_v43 }
  0x34   :  { %1318 = vmatprep.subr.bf16.mxu0 %v1442_v44 }
  0x37   :  { %1319 = vmatpush3.bf16.msra.mxu0 %v1442_v44 }
  0x38   :  { %1320 = vmatprep.subr.bf16.mxu0 %v1443_v51 }
  0x3b   :  { %1321 = vmatpush3.bf16.msra.mxu0 %v1443_v51 }
  0x3c   :  { %1322 = vmatprep.subr.bf16.mxu0 %v1444_v60 }
  0x3f   :  { %1323 = vmatpush3.bf16.msra.mxu0 %v1444_v60 }
  0x40   :  { %1328 = vmatprep.subr.bf16.mxu0 %v1445_v3 }
  0x42   :  { %1325 = vmatmul.mubr.bf16.vlgmr.msra.gmra.mrb[0].mxu0 %v85_v6  ;;  %v1458_v6 = vld [vmem:[%s1825_s2 + $0x68] sm:$0xff]  }
  0x43   :  { %1329 = vmatpush3.bf16.msra.mxu0 %v1445_v3  ;;  %1344 = vmatprep.mubr.bf16.mxu0 %v349_v8  ;;  %v1455_v3 = vld [vmem:[%s1825_s2 + $0x50] sm:$0xff]   ;;  %v1460_v8 = vld [vmem:[%s1825_s2 + $0x78] sm:$0xff]  }
  0x44   :  { %1330 = vmatprep.subr.bf16.mxu0 %v1446_v7  ;;  %1352 = vmatprep.subr.bf16.mxu1 %v1455_v3 }
  0x45   :  { %1353 = vmatpush3.bf16.msra.mxu1 %v1455_v3 }
  0x46   :  { %1354 = vmatprep.subr.bf16.mxu1 %v1456_v4 }
  0x47   :  { %1331 = vmatpush3.bf16.msra.mxu0 %v1446_v7  ;;  %v1459_v7 = vld [vmem:[%s1825_s2 + $0x70] sm:$0xff]  }
  0x48   :  { %1332 = vmatprep.subr.bf16.mxu0 %v1447_v9 }
  0x49   :  { %1355 = vmatpush3.bf16.msra.mxu1 %v1456_v4 }
  0x4a   :  { %1356 = vmatprep.subr.bf16.mxu1 %v1457_v5 }
  0x4b   :  { %1333 = vmatpush3.bf16.msra.mxu0 %v1447_v9  ;;  %v1685_v9 = vld [vmem:[%s1825_s2] sm:$0xff]  }
  0x4c   :  { %1334 = vmatprep.subr.bf16.mxu0 %v1448_v10 }
  0x4d   :  { %1357 = vmatpush3.bf16.msra.mxu1 %v1457_v5  ;;  %v1463_v5 = vld [vmem:[%s1825_s2 + $0x10] sm:$0xff]  }
  0x4e   :  { %1358 = vmatprep.subr.bf16.mxu1 %v1458_v6 }
  0x4f   :  { %1335 = vmatpush3.bf16.msra.mxu0 %v1448_v10 }
  0x50   :  { %1336 = vmatprep.subr.bf16.mxu0 %v1449_v11 }
  0x51   :  { %1359 = vmatpush3.bf16.msra.mxu1 %v1458_v6 }
  0x52   :  { %1360 = vmatprep.subr.bf16.mxu1 %v1459_v7 }
  0x53   :  { %1337 = vmatpush3.bf16.msra.mxu0 %v1449_v11 }
  0x54   :  { %1338 = vmatprep.subr.bf16.mxu0 %v1450_v12 }
  0x55   :  { %1361 = vmatpush3.bf16.msra.mxu1 %v1459_v7  ;;  %v1464_v7 = vld [vmem:[%s1825_s2 + $0x18] sm:$0xff]  }
  0x56   :  { %1362 = vmatprep.subr.bf16.mxu1 %v1460_v8 }
  0x57   :  { %1339 = vmatpush3.bf16.msra.mxu0 %v1450_v12 }
  0x58   :  { %1340 = vmatprep.subr.bf16.mxu0 %v1451_v18 }
  0x59   :  { %1363 = vmatpush3.bf16.msra.mxu1 %v1460_v8  ;;  %v1465_v8 = vld [vmem:[%s1825_s2 + $0x20] sm:$0xff]  }
  0x5a   :  { %1368 = vmatprep.subr.bf16.mxu1 %v1685_v9 }
  0x5b   :  { %1341 = vmatpush3.bf16.msra.mxu0 %v1451_v18 }
  0x5c   :  { %1342 = vmatprep.subr.bf16.mxu0 %v1452_v23 }
  0x5f   :  { %1343 = vmatpush3.bf16.msra.mxu0 %v1452_v23  ;;  %v1691_v23 = vsub.s32 0, %v547_v21  ;;  %v1468_v21 = vld [vmem:[%s1825_s2 + $0x38] sm:$0xff]  }
  0x62   :  { %1345 = vmatmul.mubr.bf16.vlgmr.msra.gmra.mrb[0].mxu0 %v366_v26  ;;  %v542_v26 = vld [vmem:[%s1827_s4] sm:$0x1] }
 0x135   :  { %v1630_v27 = vpop.f32.mrb[0].mxu0 }
 0x136   :  { %v1632_v28 = vpop.f32.mrb[1].mxu0  ;;  %v498_v34 = vmul.f32 %v1630_v27, %v1630_v27 }
 0x137   :  { %v1634_v29 = vpop.f32.mrb[2].mxu0  ;;  %v496_v31 = vmul.f32 %v1632_v28, %v1632_v28 }
 0x138   :  { %v1636_v30 = vpop.f32.mrb[3].mxu0  ;;  %v499_v37 = vmul.f32 %v1634_v29, %v1634_v29 }
 0x139   :  { %v487_v32 = vadd.f32 %v1636_v30, %v1632_v28  ;;  %v497_v33 = vmul.f32 %v1636_v30, %v1636_v30 }
 0x13b   :  { %v488_v35 = vadd.f32 %v1630_v27, %v487_v32  ;;  %v500_v36 = vadd.f32 %v497_v33, %v496_v31 }
 0x13d   :  { %v489_v38 = vadd.f32 %v1634_v29, %v488_v35  ;;  %v501_v39 = vadd.f32 %v500_v36, %v498_v34 }
 0x13f   :  { %v502_v40 = vadd.f32 %v501_v39, %v499_v37  ;;  %v490_v41 = vrot.slane %v489_v38, 4 }
 0x141   :  { %v503_v42 = vrot.slane %v502_v40, 4  ;;  %v491_v43 = vadd.f32 %v490_v41, %v489_v38 }
 0x143   :  { %v492_v44 = vrot.slane %v491_v43, 2  ;;  %v504_v45 = vadd.f32 %v503_v42, %v502_v40 }
 0x145   :  { %v493_v46 = vadd.f32 %v492_v44, %v491_v43  ;;  %v505_v47 = vrot.slane %v504_v45, 2 }
 0x147   :  { %v494_v48 = vrot.slane %v493_v46, 1  ;;  %v506_v49 = vadd.f32 %v505_v47, %v504_v45 }
 0x149   :  { %v495_v50 = vadd.f32 %v494_v48, %v493_v46  ;;  %v507_v51 = vrot.slane %v506_v49, 1 }
 0x14b   :  { %509 = vrot.lane.b32.xlu0 %v495_v50, %s1486_s1  ;;  %v508_v52 = vadd.f32 %v507_v51, %v506_v49 }
 0x14f   :  { %522 = vrot.lane.b32.xlu0 %v508_v52, %s1486_s1 }
 0x1bd   :  { %v510_v53 = vpop.permute.xlu0 %509 }
 0x1be   :  { %v511_v54 = vadd.f32 %v510_v53, %v495_v50 }
 0x1c0   :  { %512 = vrot.lane.b32.xlu1 %v511_v54, %s1487_s11 }
 0x1c1   :  { %v523_v55 = vpop.permute.xlu0 %522 }
 0x1c2   :  { %v524_v56 = vadd.f32 %v523_v55, %v508_v52 }
 0x1c4   :  { %525 = vrot.lane.b32.xlu1 %v524_v56, %s1487_s11 }
 0x232   :  { %v513_v57 = vpop.permute.xlu1 %512 }
 0x233   :  { %v514_v58 = vadd.f32 %v513_v57, %v511_v54 }
 0x235   :  { %515 = vrot.lane.b32.xlu0 %v514_v58, %s1488_s12 }
 0x236   :  { %v526_v59 = vpop.permute.xlu1 %525 }
 0x237   :  { %v527_v60 = vadd.f32 %v526_v59, %v524_v56  ;;  %v1462_v59 = vld [vmem:[%s1825_s2 + $0x8] sm:$0xff]  }
 0x239   :  { %528 = vrot.lane.b32.xlu1 %v527_v60, %s1488_s12 }
 0x2a7   :  { %v516_v61 = vpop.permute.xlu0 %515 }
 0x2a8   :  { %v517_v62 = vadd.f32 %v516_v61, %v514_v58 }
 0x2aa   :  { %518 = vrot.lane.b32.xlu0 %v517_v62, %s1489_s13 }
 0x2ab   :  { %v529_v63 = vpop.permute.xlu1 %528 }
 0x2ac   :  { %v530_v0 = vadd.f32 %v529_v63, %v527_v60 }
 0x2ae   :  { %531 = vrot.lane.b32.xlu1 %v530_v0, %s1489_s13 }
 0x31c   :  { %v519_v10 = vpop.permute.xlu0 %518 }
 0x31d   :  { %v520_v11 = vadd.f32 %v519_v10, %v517_v62 }
 0x31f   :  { %v521_v12 = vmul.f32 0.001953125, %v520_v11 }
 0x320   :  { %v532_v13 = vpop.permute.xlu1 %531 }
 0x321   :  { %v533_v14 = vadd.f32 %v532_v13, %v530_v0  ;;  %v535_v15 = vmul.f32 %v521_v12, %v521_v12 }
 0x323   :  { %v534_v16 = vmul.f32 0.001953125, %v533_v14 }
 0x325   :  { %v536_v17 = vsub.f32 %v534_v16, %v535_v15 }
 0x327   :  { %v537_v18 = vmax.f32 %v536_v17, 0.0 }
 0x329   :  { %v539_v19 = vadd.f32 1e-05, %v537_v18 }
 0x32b   :  { %1477 = vrsqrt.f32 %v539_v19 }
 0x335   :  { %v1478_v24 = vpop.eup %1477 }
 0x336   :  { %v541_v25 = vmul.f32 %v1478_v24, %v538_v22 }
 0x338   :  { %v543_v31 = vmul.f32 %v541_v25, %v521_v12  ;;  %v549_v32 = vrot.slane %v541_v25, %v1691_v23  ;;  %v1467_v12 = vld [vmem:[%s1825_s2 + $0x30] sm:$0xff]  }
 0x33a   :  { %v544_v33 = vsub.f32 %v542_v26, %v543_v31  ;;  %v551_v34 = vmul.f32 %v549_v32, %v1632_v28  ;;  %v552_v35 = vmul.f32 %v549_v32, %v1636_v30  ;;  %v553_v36 = vmul.f32 %v1630_v27, %v549_v32 }
 0x33b   :  { %v554_v37 = vmul.f32 %v1634_v29, %v549_v32 }
 0x33c   :  { %v559_v38 = vrot.slane %v544_v33, %v1691_v23 }
 0x33e   :  { %v561_v39 = vadd.f32 %v559_v38, %v551_v34  ;;  %v562_v40 = vadd.f32 %v559_v38, %v552_v35  ;;  %v563_v41 = vadd.f32 %v559_v38, %v553_v36  ;;  %v564_v42 = vadd.f32 %v559_v38, %v554_v37  ;;  %v1469_v35 = vld [vmem:[%s1825_s2 + $0x80] sm:$0xff]  }
 0x340   :  { %v565_v43 = vmax.f32 %v561_v39, 0.0  ;;  %v566_v44 = vmax.f32 %v562_v40, 0.0  ;;  %v567_v45 = vmax.f32 %v563_v41, 0.0  ;;  %v568_v46 = vmax.f32 %v564_v42, 0.0  ;;  %v1470_v40 = vld [vmem:[%s1825_s2 + $0x88] sm:$0xff]  }
 0x342   :  { %v569_v47 = vpack.c.bf16 %v566_v44, %v565_v43  ;;  %v570_v48 = vpack.c.bf16 %v568_v46, %v567_v45  ;;  %v1471_v43 = vld [vmem:[%s1825_s2 + $0x90] sm:$0xff]   ;;  %v1472_v44 = vld [vmem:[%s1825_s2 + $0x98] sm:$0xff]   ;;  %v1473_v45 = vld [vmem:[%s1825_s2 + $0xa0] sm:$0xff]  }
 0x343   :  { %v1474_v46 = vld [vmem:[%s1825_s2 + $0xa8] sm:$0xff]  }
 0x344   :  { %v573_v49 = vrot.slane %v569_v47, 4  ;;  %v574_v28 = vrot.slane %v570_v48, 4  ;;  %v1475_v48 = vld [vmem:[%s1825_s2 + $0xb0] sm:$0xff]  }
 0x346   :  { %579 = vst [vmem:[#allocation2 + $0x18] ss:$-4 sps:$4 sm:$0xff] %v574_v28   ;;  %577 = vst [vmem:[#allocation2 + $0x8] ss:$-4 sps:$4 sm:$0xff] %v573_v49  }
 0x34d   :  { %v582_v30 = vld [vmem:[#allocation2 + $0x8] sm:$0xf]  ;;  %v637_v27 = vld [vmem:[#allocation2] sm:$0xf0]  ;;  %v584_v50 = vld [vmem:[#allocation2 + $0x18] sm:$0xf] }
 0x34e   :  { %v643_v29 = vrot.slane %v637_v27, 4  ;;  %v644_v51 = vrot.slane %v582_v30, 4  ;;  %v1702_v52 = vld [vmem:[#allocation2 + $0x10] sm:$0xf0]  ;;  %v647_v53 = vrot.slane %v584_v50, 4  ;;  %v594_v54 = vshrl.u32 %v582_v30, 16 }
 0x34f   :  { %v646_v55 = vrot.slane %v1702_v52, 4  ;;  %v581_v56 = vld [vmem:[#allocation2] sm:$0xf8]  ;;  %v597_v57 = vshll.u32 %v582_v30, 16  ;;  %v583_v10 = vld [vmem:[#allocation2 + $0x10] sm:$0xf8] }
 0x350   :  { %v645_v58 = vsel %vm110_vm0, %v643_v29, %v644_v51  ;;  %v586_v60 = vshrl.u32 %v581_v56, 16  ;;  %v589_v61 = vshll.u32 %v581_v56, 16  ;;  %v596_v62 = vrot.slane %v594_v54, 3  ;;  %v862_v11 = vld [vmem:[#allocation2 + $0x8] sm:$0x1f] }
 0x351   :  { %1364 = vmatprep.mubr.bf16.mxu1 %v645_v58  ;;  %v648_v63 = vsel %vm110_vm0, %v646_v55, %v647_v53  ;;  %v599_v0 = vrot.slane %v597_v57, 4  ;;  %v603_v13 = vshrl.u32 %v583_v10, 16  ;;  %v606_v14 = vshll.u32 %v583_v10, 16  ;;  %v863_v47 = vld [vmem:[#allocation2 + $0x18] sm:$0x1f] }
 0x352   :  { %1365 = vmatmul.mubr.bf16.vlgmr.msra.gmra.mrb[0].mxu1 %v648_v63  ;;  %v588_v1 = vrot.slane %v586_v60, 3  ;;  %v591_v2 = vrot.slane %v589_v61, 4  ;;  %v611_v15 = vshrl.u32 %v584_v50, 16  ;;  %v614_v16 = vshll.u32 %v584_v50, 16  ;;  %v1476_v50 = vld [vmem:[%s1825_s2 + $0xb8] sm:$0xff]  }
 0x353   :  { %1369 = vmatpush3.bf16.msra.mxu1 %v1685_v9  ;;  %v600_v3 = vor.u32 %v599_v0, %v596_v62  ;;  %v1466_v9 = vld [vmem:[%s1825_s2 + $0x28] sm:$0xff]   ;;  %v865_v17 = vshrl.u32 %v637_v27, 16  ;;  %v868_v18 = vshll.u32 %v637_v27, 16  ;;  %v873_v19 = vshrl.u32 %v862_v11, 16 }
 0x354   :  { %1370 = vmatprep.subr.bf16.mxu1 %v1462_v59  ;;  %v592_v4 = vor.u32 %v591_v2, %v588_v1  ;;  %v876_v20 = vshll.u32 %v862_v11, 16  ;;  %v605_v22 = vrot.slane %v603_v13, 3  ;;  %v608_v24 = vrot.slane %v606_v14, 4 }
 0x355   :  { %v613_v25 = vrot.slane %v611_v15, 3  ;;  %v616_v26 = vrot.slane %v614_v16, 4  ;;  %v867_v31 = vrot.slane %v865_v17, 4  ;;  %v870_v32 = vrot.slane %v868_v18, 5 }
 0x356   :  { %v601_v6 = vsel %vm51_vm1, %v592_v4, %v600_v3  ;;  %v875_v33 = vrot.slane %v873_v19, 4  ;;  %v878_v34 = vrot.slane %v876_v20, 5  ;;  %v609_v36 = vor.u32 %v608_v24, %v605_v22 }
 0x357   :  { %1384 = vmatprep.mubr.bf16.mxu1 %v601_v6  ;;  %1371 = vmatpush3.bf16.msra.mxu1 %v1462_v59  ;;  %v617_v37 = vor.u32 %v616_v26, %v613_v25  ;;  %v871_v38 = vor.u32 %v870_v32, %v867_v31  ;;  %v882_v49 = vshrl.u32 %v1702_v52, 16  ;;  %v885_v28 = vshll.u32 %v1702_v52, 16 }
 0x358   :  { %1372 = vmatprep.subr.bf16.mxu1 %v1463_v5  ;;  %v879_v39 = vor.u32 %v878_v34, %v875_v33  ;;  %v890_v30 = vshrl.u32 %v863_v47, 16  ;;  %v893_v27 = vshll.u32 %v863_v47, 16 }
 0x359   :  { %v618_v41 = vsel %vm51_vm1, %v609_v36, %v617_v37  ;;  %v884_v29 = vrot.slane %v882_v49, 4  ;;  %v887_v51 = vrot.slane %v885_v28, 5  ;;  %v1073_v49 = vld [vmem:[%s1829_s6] sm:$0x1] }
 0x35a   :  { %v880_v42 = vsel %vm332_vm2, %v871_v38, %v879_v39  ;;  %v892_v53 = vrot.slane %v890_v30, 4  ;;  %v895_v54 = vrot.slane %v893_v27, 5 }
 0x35b   :  { %1373 = vmatpush3.bf16.msra.mxu1 %v1463_v5  ;;  %v888_v55 = vor.u32 %v887_v51, %v884_v29 }
 0x35c   :  { %1374 = vmatprep.subr.bf16.mxu1 %v1464_v7  ;;  %v896_v56 = vor.u32 %v895_v54, %v892_v53 }
 0x35e   :  { %v897_v57 = vsel %vm332_vm2, %v888_v55, %v896_v56 }
 0x35f   :  { %1375 = vmatpush3.bf16.msra.mxu1 %v1464_v7 }
 0x360   :  { %1376 = vmatprep.subr.bf16.mxu1 %v1465_v8 }
 0x363   :  { %1377 = vmatpush3.bf16.msra.mxu1 %v1465_v8 }
 0x364   :  { %1378 = vmatprep.subr.bf16.mxu1 %v1466_v9 }
 0x367   :  { %1379 = vmatpush3.bf16.msra.mxu1 %v1466_v9 }
 0x368   :  { %1380 = vmatprep.subr.bf16.mxu1 %v1467_v12 }
 0x36b   :  { %1381 = vmatpush3.bf16.msra.mxu1 %v1467_v12 }
 0x36c   :  { %1382 = vmatprep.subr.bf16.mxu1 %v1468_v21 }
 0x36f   :  { %1383 = vmatpush3.bf16.msra.mxu1 %v1468_v21 }
 0x370   :  { %1388 = vmatprep.subr.bf16.mxu1 %v1469_v35 }
 0x372   :  { %1385 = vmatmul.mubr.bf16.vlgmr.msra.gmra.mrb[0].mxu1 %v618_v41 }
 0x373   :  { %1389 = vmatpush3.bf16.msra.mxu1 %v1469_v35  ;;  %1404 = vmatprep.mubr.bf16.mxu1 %v880_v42 }
 0x374   :  { %1390 = vmatprep.subr.bf16.mxu1 %v1470_v40 }
 0x377   :  { %1391 = vmatpush3.bf16.msra.mxu1 %v1470_v40 }
 0x378   :  { %1392 = vmatprep.subr.bf16.mxu1 %v1471_v43 }
 0x37b   :  { %1393 = vmatpush3.bf16.msra.mxu1 %v1471_v43 }
 0x37c   :  { %1394 = vmatprep.subr.bf16.mxu1 %v1472_v44 }
 0x37f   :  { %1395 = vmatpush3.bf16.msra.mxu1 %v1472_v44 }
 0x380   :  { %1396 = vmatprep.subr.bf16.mxu1 %v1473_v45 }
 0x383   :  { %1397 = vmatpush3.bf16.msra.mxu1 %v1473_v45 }
 0x384   :  { %1398 = vmatprep.subr.bf16.mxu1 %v1474_v46 }
 0x387   :  { %1399 = vmatpush3.bf16.msra.mxu1 %v1474_v46  ;;  %v1069_v46 = vld [vmem:[%s1828_s5] sm:$0x1] }
 0x388   :  { %1400 = vmatprep.subr.bf16.mxu1 %v1475_v48 }
 0x38b   :  { %1401 = vmatpush3.bf16.msra.mxu1 %v1475_v48 }
 0x38c   :  { %1402 = vmatprep.subr.bf16.mxu1 %v1476_v50 }
 0x38f   :  { %1403 = vmatpush3.bf16.msra.mxu1 %v1476_v50 }
 0x392   :  { %1405 = vmatmul.mubr.bf16.vlgmr.msra.gmra.mrb[0].mxu1 %v897_v57 }
 0x465   :  { %v1759_v52 = vpop.f32.mrb[0].mxu1 }
 0x466   :  { %v1761_v58 = vpop.f32.mrb[1].mxu1  ;;  %v1029_v0 = vmul.f32 %v1759_v52, %v1759_v52 }
 0x467   :  { %v1763_v59 = vpop.f32.mrb[2].mxu1  ;;  %v1027_v61 = vmul.f32 %v1761_v58, %v1761_v58 }
 0x468   :  { %v1765_v60 = vpop.f32.mrb[3].mxu1  ;;  %v1030_v3 = vmul.f32 %v1763_v59, %v1763_v59 }
 0x469   :  { %v1018_v62 = vadd.f32 %v1765_v60, %v1761_v58  ;;  %v1028_v63 = vmul.f32 %v1765_v60, %v1765_v60 }
 0x46b   :  { %v1019_v1 = vadd.f32 %v1759_v52, %v1018_v62  ;;  %v1031_v2 = vadd.f32 %v1028_v63, %v1027_v61 }
 0x46d   :  { %v1020_v4 = vadd.f32 %v1763_v59, %v1019_v1  ;;  %v1032_v5 = vadd.f32 %v1031_v2, %v1029_v0 }
 0x46f   :  { %v1021_v6 = vrot.slane %v1020_v4, 4  ;;  %v1033_v7 = vadd.f32 %v1032_v5, %v1030_v3  ;;  %v1484_v3 = vld [vmem:[%s1824_s0 + $0x18] sm:$0xff] }
 0x471   :  { %v1022_v8 = vadd.f32 %v1021_v6, %v1020_v4  ;;  %v1034_v9 = vrot.slane %v1033_v7, 4 }
 0x473   :  { %v1023_v10 = vrot.slane %v1022_v8, 2  ;;  %v1035_v11 = vadd.f32 %v1034_v9, %v1033_v7 }
 0x475   :  { %v1024_v12 = vadd.f32 %v1023_v10, %v1022_v8  ;;  %v1036_v13 = vrot.slane %v1035_v11, 2 }
 0x477   :  { %v1025_v14 = vrot.slane %v1024_v12, 1  ;;  %v1037_v15 = vadd.f32 %v1036_v13, %v1035_v11 }
 0x479   :  { %v1026_v16 = vadd.f32 %v1025_v14, %v1024_v12  ;;  %v1038_v17 = vrot.slane %v1037_v15, 1 }
 0x47b   :  { %1040 = vrot.lane.b32.xlu0 %v1026_v16, %s1486_s1  ;;  %v1039_v18 = vadd.f32 %v1038_v17, %v1037_v15 }
 0x47d   :  { %1053 = vrot.lane.b32.xlu1 %v1039_v18, %s1486_s1 }
 0x4ed   :  { %v1041_v19 = vpop.permute.xlu0 %1040 }
 0x4ee   :  { %v1042_v20 = vadd.f32 %v1041_v19, %v1026_v16 }
 0x4ef   :  { %v1054_v21 = vpop.permute.xlu1 %1053 }
 0x4f0   :  { %v1055_v22 = vadd.f32 %v1054_v21, %v1039_v18  ;;  %1043 = vrot.lane.b32.xlu0 %v1042_v20, %s1487_s11 }
 0x4f2   :  { %1056 = vrot.lane.b32.xlu1 %v1055_v22, %s1487_s11 }
 0x562   :  { %v1044_v24 = vpop.permute.xlu0 %1043 }
 0x563   :  { %v1045_v25 = vadd.f32 %v1044_v24, %v1042_v20 }
 0x564   :  { %v1057_v26 = vpop.permute.xlu1 %1056 }
 0x565   :  { %v1058_v31 = vadd.f32 %v1057_v26, %v1055_v22  ;;  %1046 = vrot.lane.b32.xlu0 %v1045_v25, %s1488_s12 }
 0x567   :  { %1059 = vrot.lane.b32.xlu1 %v1058_v31, %s1488_s12 }
 0x5d7   :  { %v1047_v32 = vpop.permute.xlu0 %1046 }
 0x5d8   :  { %v1048_v33 = vadd.f32 %v1047_v32, %v1045_v25 }
 0x5d9   :  { %v1060_v34 = vpop.permute.xlu1 %1059 }
 0x5da   :  { %v1061_v35 = vadd.f32 %v1060_v34, %v1058_v31  ;;  %1049 = vrot.lane.b32.xlu0 %v1048_v33, %s1489_s13 }
 0x5dc   :  { %1062 = vrot.lane.b32.xlu1 %v1061_v35, %s1489_s13 }
 0x64c   :  { %v1050_v36 = vpop.permute.xlu0 %1049 }
 0x64d   :  { %v1051_v37 = vadd.f32 %v1050_v36, %v1048_v33 }
 0x64e   :  { %v1063_v38 = vpop.permute.xlu1 %1062 }
 0x64f   :  { %v1052_v39 = vmul.f32 0.001953125, %v1051_v37  ;;  %v1064_v40 = vadd.f32 %v1063_v38, %v1061_v35 }
 0x651   :  { %v1066_v41 = vmul.f32 %v1052_v39, %v1052_v39  ;;  %v1065_v42 = vmul.f32 0.001953125, %v1064_v40 }
 0x653   :  { %v1067_v43 = vsub.f32 %v1065_v42, %v1066_v41 }
 0x655   :  { %v1068_v44 = vmax.f32 %v1067_v43, 0.0 }
 0x657   :  { %v1070_v45 = vadd.f32 1e-05, %v1068_v44 }
 0x659   :  { %1479 = vrsqrt.f32 %v1070_v45 }
 0x663   :  { %v1480_v47 = vpop.eup %1479 }
 0x664   :  { %v1072_v48 = vmul.f32 %v1480_v47, %v1069_v46 }
 0x666   :  { %v1074_v28 = vmul.f32 %v1072_v48, %v1052_v39  ;;  %v1080_v30 = vrot.slane %v1072_v48, %v1691_v23 }
 0x668   :  { %v1075_v27 = vsub.f32 %v1073_v49, %v1074_v28  ;;  %v1082_v50 = vmul.f32 %v1080_v30, %v1761_v58  ;;  %v1083_v29 = vmul.f32 %v1080_v30, %v1765_v60  ;;  %v1084_v51 = vmul.f32 %v1759_v52, %v1080_v30  ;;  %v1481_v58 = vld [vmem:[%s1824_s0] sm:$0xff]  ;;  %v1482_v52 = vld [vmem:[%s1824_s0 + $0x8] sm:$0xff] }
 0x669   :  { %v1085_v53 = vmul.f32 %v1763_v59, %v1080_v30 }
 0x66a   :  { %v1090_v54 = vrot.slane %v1075_v27, %v1691_v23  ;;  %v1483_v23 = vld [vmem:[%s1824_s0 + $0x10] sm:$0xff] }
 0x66c   :  { %v1092_v55 = vadd.f32 %v1090_v54, %v1082_v50  ;;  %v1093_v56 = vadd.f32 %v1090_v54, %v1083_v29  ;;  %v1094_v57 = vadd.f32 %v1090_v54, %v1084_v51  ;;  %v1095_v61 = vadd.f32 %v1090_v54, %v1085_v53 }
 0x66e   :  { %v1096_v62 = vmax.f32 %v1092_v55, 0.0  ;;  %v1097_v63 = vmax.f32 %v1093_v56, 0.0  ;;  %v1098_v0 = vmax.f32 %v1094_v57, 0.0  ;;  %v1099_v1 = vmax.f32 %v1095_v61, 0.0 }
 0x670   :  { %v1104_v2 = vadd.f32 %v1481_v58, %v1096_v62  ;;  %v1105_v59 = vadd.f32 %v1482_v52, %v1097_v63  ;;  %v1106_v60 = vadd.f32 %v1483_v23, %v1098_v0  ;;  %v1107_v4 = vadd.f32 %v1484_v3, %v1099_v1 }
 0x672   :  { %1108 = vst [vmem:[%s1830_s7] sm:$0xff] %v1104_v2  ;;  %1109 = vst [vmem:[%s1830_s7 + $0x8] sm:$0xff] %v1105_v59 }
 0x673   :  { %1110 = vst [vmem:[%s1830_s7 + $0x10] sm:$0xff] %v1106_v60  ;;  %1111 = vst [vmem:[%s1830_s7 + $0x18] sm:$0xff] %v1107_v4 }

</bundles_post_ra>
